<compile_context>
chip_gen: v5e
topology: v5e:2x2
jax: 0.10.0
libtpu: 0.0.40
codegen_flags: <defaults>
</compile_context>

<pallas_src>
import functools

import jax
import jax.numpy as jnp
from jax import lax
from jax.experimental import pallas as pl
from jax.experimental.pallas import tpu as pltpu


def _conv_up_kernel(x1d_ref, x2_ref, wt_ref, bt_ref, w1_ref, b1_ref,
                    w2_ref, b2_ref, o_ref, buf_ref, *, L, offs):
    """Whole batch in one step; spatial (and batch) flattened on the lane axis.

    x1d_ref: (4*Cin, L)        stride-2 dilated x1 (per 2x2 tap), L = N*Hup*Wup
    x2_ref : (Cx2, L)          center-cropped skip connection
    wt_ref : (Cup, 4*Cin)      transposed-conv weight, tap-major K
    bt_ref : (Cup, 1)
    w1_ref : (Cout, 9*Ccat)    conv1 weight, im2col layout
    b1_ref : (Cout, 1)
    w2_ref : (Cout, 9*Ccat)    conv2 weight, im2col layout (K zero-padded)
    b2_ref : (Cout, 1)
    o_ref  : (Cout, L)         flat output (valid region sliced by the wrapper)
    buf_ref: (Ccat, L + 128)   VMEM staging buffer (right zero pad)
    """
    f32 = jnp.float32
    cup = wt_ref.shape[0]
    ccat = buf_ref.shape[0]
    pad_w = buf_ref.shape[1] - L

    # ---- ConvTranspose2d(k=2, s=2): ONE matmul against the pre-dilated x1 --
    up = jnp.dot(wt_ref[...], x1d_ref[...].astype(f32),
                 preferred_element_type=f32) + bt_ref[...]          # (Cup, L)

    # ---- stage cat = [up ; crop(x2)] into the right-padded scratch ---------
    buf_ref[:, pl.ds(L, pad_w)] = jnp.zeros((ccat, pad_w), f32)     # zero once
    buf_ref[pl.ds(0, cup), pl.ds(0, L)] = up
    buf_ref[pl.ds(cup, ccat - cup), pl.ds(0, L)] = x2_ref[...].astype(f32)

    # ---- 3x3 valid conv as ONE im2col matmul (K = 9*Ccat) + bias + ReLU ----
    # Out-of-row / wrap "junk" columns only land at spatial positions the
    # wrapper discards (valid region is [0, Hup-4) x [0, Wup-4) per image).
    def conv3x3(w_ref, b_ref):
        patches = jnp.concatenate(
            [buf_ref[:, pl.ds(off, L)] for off in offs], axis=0)    # (9*Ccat, L)
        y = jnp.dot(w_ref[...], patches, preferred_element_type=f32) + b_ref[...]
        return jnp.maximum(y, 0.0)

    y1 = conv3x3(w1_ref, b1_ref)                                    # (Cout, L)
    buf_ref[pl.ds(0, y1.shape[0]), pl.ds(0, L)] = y1                # reuse rows
    y2 = conv3x3(w2_ref, b2_ref)                                    # stale x2
    o_ref[...] = y2.astype(o_ref.dtype)                             # rows hit 0-weights


@jax.jit
def conv_up(x1, x2, wt, bt, w1, b1, w2, b2):
    """Pallas forward of Conv_up.

    x1: (N, in_ch, H1, W1)      x2: (N, in_ch - out_ch, Hx, Wx)
    wt: (in_ch, out_ch, 2, 2)   PyTorch ConvTranspose2d layout; bt: (out_ch,)
    w1: (3, 3, in_ch, out_ch)   HWIO; b1: (out_ch,)
    w2: (3, 3, out_ch, out_ch)  HWIO; b2: (out_ch,)
    returns (N, out_ch, 2*H1 - 4, 2*W1 - 4) in NCHW, matching PyTorch.
    """
    n, cin, h1, w1s = x1.shape
    cup = wt.shape[1]
    hup, wup = 2 * h1, 2 * w1s
    hw = hup * wup
    L = n * hw                       # batch stacked on the lane axis
    _, cx2, hx, wx = x2.shape
    ccat = cup + cx2
    cout = w1.shape[-1]
    assert w1.shape[2] == ccat and cup == cout
    pad_w = 128
    assert 2 * wup + 2 <= pad_w and hup >= 5 and wup >= 5

    # ---- extract_img (center crop), flatten spatial, stack batch on lanes --
    oy, ox = (hx - hup) // 2, (wx - wup) // 2
    x2f = x2[:, :, oy:oy + hup, ox:ox + wup].reshape(n, cx2, hw)
    x2f = jnp.transpose(x2f, (1, 0, 2)).reshape(cx2, L)

    # ---- stride-2 dilate x1 per 2x2 tap (tiny, wrapper-side) ---------------
    # x1d[t*Cin+c, (2i+ky)*Wup + 2j+kx] = x1[c,i,j] iff t == ky*2+kx, else 0.
    tap_eye = jnp.eye(4, dtype=x1.dtype).reshape(4, 2, 2)
    x1d = (tap_eye[None, :, None, None, :, None, :] *
           x1[:, None, :, :, None, :, None])             # (n,4,cin,h1,2,w1,2)
    x1d = x1d.reshape(n, 4 * cin, hw)
    x1d = jnp.transpose(x1d, (1, 0, 2)).reshape(4 * cin, L)

    # ---- one-off parameter repacking (tiny) --------------------------------
    wtf = jnp.transpose(wt, (2, 3, 1, 0)).reshape(4, cup, cin)      # (tap,o,c)
    wtf = jnp.transpose(wtf, (1, 0, 2)).reshape(cup, 4 * cin)       # K = tap*Cin+c
    btc = bt.reshape(cup, 1)
    w1m = jnp.transpose(w1, (3, 0, 1, 2)).reshape(cout, 9 * ccat)   # K = tap*Ccat+c
    # conv2 weight zero-padded along K so every im2col load stays an aligned
    # 8-row slice; stale x2 rows in the scratch only ever hit zero weights.
    w2p = jnp.zeros((3, 3, ccat, cout), w2.dtype).at[:, :, :cout, :].set(w2)
    w2m = jnp.transpose(w2p, (3, 0, 1, 2)).reshape(cout, 9 * ccat)
    b1c = b1.reshape(cout, 1)
    b2c = b2.reshape(cout, 1)

    offs = tuple(ky * wup + kx for ky in range(3) for kx in range(3))
    kernel = functools.partial(_conv_up_kernel, L=L, offs=offs)

    out_flat = pl.pallas_call(
        kernel,
        out_shape=jax.ShapeDtypeStruct((cout, L), x1.dtype),
        grid=(1,),
        in_specs=[
            pl.BlockSpec((4 * cin, L), lambda i: (0, 0)),
            pl.BlockSpec((cx2, L), lambda i: (0, 0)),
            pl.BlockSpec((cup, 4 * cin), lambda i: (0, 0)),
            pl.BlockSpec((cup, 1), lambda i: (0, 0)),
            pl.BlockSpec((cout, 9 * ccat), lambda i: (0, 0)),
            pl.BlockSpec((cout, 1), lambda i: (0, 0)),
            pl.BlockSpec((cout, 9 * ccat), lambda i: (0, 0)),
            pl.BlockSpec((cout, 1), lambda i: (0, 0)),
        ],
        out_specs=pl.BlockSpec((cout, L), lambda i: (0, 0)),
        scratch_shapes=[pltpu.VMEM((ccat, L + pad_w), jnp.float32)],
        compiler_params=pltpu.CompilerParams(
            dimension_semantics=("arbitrary",)),
    )(x1d, x2f, wtf, btc, w1m, b1c, w2m, b2c)

    out = out_flat.reshape(cout, n, hup, wup)
    out = jnp.transpose(out, (1, 0, 2, 3))[:, :, :hup - 4, :wup - 4]
    return out


def _reference(x1, x2, wt, bt, w1, b1, w2, b2):
    """Pure-JAX reference (einsum transposed conv + lax convs)."""
    n, cin, h1, w1s = x1.shape
    cup = wt.shape[1]
    hup, wup = 2 * h1, 2 * w1s
    up = jnp.einsum('ncij,cokl->noikjl', x1, wt).reshape(n, cup, hup, wup)
    up = up + bt[None, :, None, None]
    _, _, hx, wx = x2.shape
    oy, ox = (hx - hup) // 2, (wx - wup) // 2
    cat = jnp.concatenate([up, x2[:, :, oy:oy + hup, ox:ox + wup]], axis=1)
    dn = lax.conv_dimension_numbers(cat.shape, w1.shape, ("NCHW", "HWIO", "NCHW"))
    y = lax.conv_general_dilated(cat, w1, (1, 1), "VALID", dimension_numbers=dn)
    y = jnp.maximum(y + b1[None, :, None, None], 0.0)
    dn2 = lax.conv_dimension_numbers(y.shape, w2.shape, ("NCHW", "HWIO", "NCHW"))
    y = lax.conv_general_dilated(y, w2, (1, 1), "VALID", dimension_numbers=dn2)
    y = jnp.maximum(y + b2[None, :, None, None], 0.0)
    return y


if __name__ == "__main__":
    # Conv_up(in_ch=8, out_ch=4): x1 has in_ch channels, x2 (skip) has
    # in_ch - out_ch channels so the concat has in_ch channels.
    N, in_ch, out_ch = 2, 8, 4
    H1 = W1 = 8        # x1 spatial -> upsampled to 16x16
    HX = WX = 20       # x2 spatial (center-cropped to 16x16)

    key = jax.random.PRNGKey(0)
    ks = jax.random.split(key, 8)
    x1 = jax.random.normal(ks[0], (N, in_ch, H1, W1), jnp.float32)
    x2 = jax.random.normal(ks[1], (N, in_ch - out_ch, HX, WX), jnp.float32)

    su = 1.0 / jnp.sqrt(in_ch * 4.0)
    wt = jax.random.uniform(ks[2], (in_ch, out_ch, 2, 2), jnp.float32, -su, su)
    bt = jax.random.uniform(ks[3], (out_ch,), jnp.float32, -su, su)
    s1 = 1.0 / jnp.sqrt(in_ch * 9.0)
    w1 = jax.random.uniform(ks[4], (3, 3, in_ch, out_ch), jnp.float32, -s1, s1)
    b1 = jax.random.uniform(ks[5], (out_ch,), jnp.float32, -s1, s1)
    s2 = 1.0 / jnp.sqrt(out_ch * 9.0)
    w2 = jax.random.uniform(ks[6], (3, 3, out_ch, out_ch), jnp.float32, -s2, s2)
    b2 = jax.random.uniform(ks[7], (out_ch,), jnp.float32, -s2, s2)

    out = jax.block_until_ready(conv_up(x1, x2, wt, bt, w1, b1, w2, b2))
    ref = jax.block_until_ready(_reference(x1, x2, wt, bt, w1, b1, w2, b2))

    assert out.shape == (N, out_ch, 2 * H1 - 4, 2 * W1 - 4), out.shape
    max_err = float(jnp.max(jnp.abs(out - ref)))
    assert jnp.allclose(out, ref, atol=2e-4, rtol=2e-4), max_err
    print("KERNEL_OK")
</pallas_src>

<mosaic_0001>
module attributes {stable_mosaic.version = 11 : i64} {
  func.func @_conv_up_kernel(%arg0: i32, %arg1: memref<32x512xf32, #tpu.memory_space<vmem>>, %arg2: memref<4x512xf32, #tpu.memory_space<vmem>>, %arg3: memref<4x32xf32, #tpu.memory_space<vmem>>, %arg4: memref<4x1xf32, #tpu.memory_space<vmem>>, %arg5: memref<4x72xf32, #tpu.memory_space<vmem>>, %arg6: memref<4x1xf32, #tpu.memory_space<vmem>>, %arg7: memref<4x72xf32, #tpu.memory_space<vmem>>, %arg8: memref<4x1xf32, #tpu.memory_space<vmem>>, %arg9: memref<4x512xf32, #tpu.memory_space<vmem>>, %arg10: memref<8x640xf32, #tpu.memory_space<vmem>>) attributes {dimension_semantics = [#tpu.dimension_semantics<arbitrary>], iteration_bounds = array<i64: 1>, scalar_prefetch = 0 : i64, scratch_operands = 1 : i64, tpu.core_type = #tpu.core_type<tc>, window_params = [{pipeline_mode = #tpu.pipeline_mode<synchronous>, transform_indices = @transform_0, window_bounds = array<i64: 32, 512>}, {pipeline_mode = #tpu.pipeline_mode<synchronous>, transform_indices = @transform_1, window_bounds = array<i64: 4, 512>}, {pipeline_mode = #tpu.pipeline_mode<synchronous>, transform_indices = @transform_2, window_bounds = array<i64: 4, 32>}, {pipeline_mode = #tpu.pipeline_mode<synchronous>, transform_indices = @transform_3, window_bounds = array<i64: 4, 1>}, {pipeline_mode = #tpu.pipeline_mode<synchronous>, transform_indices = @transform_4, window_bounds = array<i64: 4, 72>}, {pipeline_mode = #tpu.pipeline_mode<synchronous>, transform_indices = @transform_5, window_bounds = array<i64: 4, 1>}, {pipeline_mode = #tpu.pipeline_mode<synchronous>, transform_indices = @transform_6, window_bounds = array<i64: 4, 72>}, {pipeline_mode = #tpu.pipeline_mode<synchronous>, transform_indices = @transform_7, window_bounds = array<i64: 4, 1>}, {pipeline_mode = #tpu.pipeline_mode<synchronous>, transform_indices = @transform_8, window_bounds = array<i64: 4, 512>}]} {
    %c0 = arith.constant 0 : index
    %c0_0 = arith.constant 0 : index
    %0 = vector.load %arg3[%c0, %c0_0] : memref<4x32xf32, #tpu.memory_space<vmem>>, vector<4x32xf32>
    %c0_1 = arith.constant 0 : index
    %c0_2 = arith.constant 0 : index
    %1 = vector.load %arg1[%c0_1, %c0_2] : memref<32x512xf32, #tpu.memory_space<vmem>>, vector<32x512xf32>
    %cst = arith.constant dense<0.000000e+00> : vector<4x512xf32>
    %2 = tpu.matmul %0, %1, %cst {dimension_numbers = #tpu.dot_dimension_numbers<[1], [0], [0], [1], [0, 0, 1, 1], [], []>} : vector<4x32xf32>, vector<32x512xf32>, vector<4x512xf32> -> vector<4x512xf32>
    %c0_3 = arith.constant 0 : index
    %c0_4 = arith.constant 0 : index
    %3 = vector.load %arg4[%c0_3, %c0_4] : memref<4x1xf32, #tpu.memory_space<vmem>>, vector<4x1xf32>
    %4 = vector.broadcast %3 : vector<4x1xf32> to vector<4x512xf32>
    %5 = arith.addf %2, %4 : vector<4x512xf32>
    %cst_5 = arith.constant 0.000000e+00 : f32
    %6 = vector.broadcast %cst_5 : f32 to vector<8x128xf32>
    %c0_6 = arith.constant 0 : index
    %c512 = arith.constant 512 : index
    %7 = vector.load %arg10[%c0_6, %c512] : memref<8x640xf32, #tpu.memory_space<vmem>>, vector<8x128xf32>
    tpu.vector_store %arg10[%c0_6, %c512], %6 {strides = array<i32>} : memref<8x640xf32, #tpu.memory_space<vmem>>, vector<8x128xf32>,
    %c0_7 = arith.constant 0 : index
    %c0_8 = arith.constant 0 : index
    %8 = vector.load %arg10[%c0_7, %c0_8] : memref<8x640xf32, #tpu.memory_space<vmem>>, vector<4x512xf32>
    tpu.vector_store %arg10[%c0_7, %c0_8], %5 {strides = array<i32>} : memref<8x640xf32, #tpu.memory_space<vmem>>, vector<4x512xf32>,
    %c0_9 = arith.constant 0 : index
    %c0_10 = arith.constant 0 : index
    %9 = vector.load %arg2[%c0_9, %c0_10] : memref<4x512xf32, #tpu.memory_space<vmem>>, vector<4x512xf32>
    %c4 = arith.constant 4 : index
    %c0_11 = arith.constant 0 : index
    %10 = vector.load %arg10[%c4, %c0_11] : memref<8x640xf32, #tpu.memory_space<vmem>>, vector<4x512xf32>
    tpu.vector_store %arg10[%c4, %c0_11], %9 {strides = array<i32>} : memref<8x640xf32, #tpu.memory_space<vmem>>, vector<4x512xf32>,
    %c0_12 = arith.constant 0 : index
    %c0_13 = arith.constant 0 : index
    %11 = vector.load %arg10[%c0_12, %c0_13] : memref<8x640xf32, #tpu.memory_space<vmem>>, vector<8x512xf32>
    %c0_14 = arith.constant 0 : index
    %c1 = arith.constant 1 : index
    %12 = vector.load %arg10[%c0_14, %c1] : memref<8x640xf32, #tpu.memory_space<vmem>>, vector<8x512xf32>
    %c0_15 = arith.constant 0 : index
    %c2 = arith.constant 2 : index
    %13 = vector.load %arg10[%c0_15, %c2] : memref<8x640xf32, #tpu.memory_space<vmem>>, vector<8x512xf32>
    %c0_16 = arith.constant 0 : index
    %c16 = arith.constant 16 : index
    %14 = vector.load %arg10[%c0_16, %c16] : memref<8x640xf32, #tpu.memory_space<vmem>>, vector<8x512xf32>
    %c0_17 = arith.constant 0 : index
    %c17 = arith.constant 17 : index
    %15 = vector.load %arg10[%c0_17, %c17] : memref<8x640xf32, #tpu.memory_space<vmem>>, vector<8x512xf32>
    %c0_18 = arith.constant 0 : index
    %c18 = arith.constant 18 : index
    %16 = vector.load %arg10[%c0_18, %c18] : memref<8x640xf32, #tpu.memory_space<vmem>>, vector<8x512xf32>
    %c0_19 = arith.constant 0 : index
    %c32 = arith.constant 32 : index
    %17 = vector.load %arg10[%c0_19, %c32] : memref<8x640xf32, #tpu.memory_space<vmem>>, vector<8x512xf32>
    %c0_20 = arith.constant 0 : index
    %c33 = arith.constant 33 : index
    %18 = vector.load %arg10[%c0_20, %c33] : memref<8x640xf32, #tpu.memory_space<vmem>>, vector<8x512xf32>
    %c0_21 = arith.constant 0 : index
    %c34 = arith.constant 34 : index
    %19 = vector.load %arg10[%c0_21, %c34] : memref<8x640xf32, #tpu.memory_space<vmem>>, vector<8x512xf32>
    %20 = tpu.concatenate %11, %12, %13, %14, %15, %16, %17, %18, %19 in 0 : vector<8x512xf32>, vector<8x512xf32>, vector<8x512xf32>, vector<8x512xf32>, vector<8x512xf32>, vector<8x512xf32>, vector<8x512xf32>, vector<8x512xf32>, vector<8x512xf32> -> vector<72x512xf32>
    %c0_22 = arith.constant 0 : index
    %c0_23 = arith.constant 0 : index
    %21 = vector.load %arg5[%c0_22, %c0_23] : memref<4x72xf32, #tpu.memory_space<vmem>>, vector<4x72xf32>
    %cst_24 = arith.constant dense<0.000000e+00> : vector<4x512xf32>
    %22 = tpu.matmul %21, %20, %cst_24 {dimension_numbers = #tpu.dot_dimension_numbers<[1], [0], [0], [1], [0, 0, 1, 1], [], []>} : vector<4x72xf32>, vector<72x512xf32>, vector<4x512xf32> -> vector<4x512xf32>
    %c0_25 = arith.constant 0 : index
    %c0_26 = arith.constant 0 : index
    %23 = vector.load %arg6[%c0_25, %c0_26] : memref<4x1xf32, #tpu.memory_space<vmem>>, vector<4x1xf32>
    %24 = vector.broadcast %23 : vector<4x1xf32> to vector<4x512xf32>
    %25 = arith.addf %22, %24 : vector<4x512xf32>
    %cst_27 = arith.constant 0.000000e+00 : f32
    %26 = vector.broadcast %cst_27 : f32 to vector<4x512xf32>
    %27 = arith.maximumf %25, %26 : vector<4x512xf32>
    %c0_28 = arith.constant 0 : index
    %c0_29 = arith.constant 0 : index
    %28 = vector.load %arg10[%c0_28, %c0_29] : memref<8x640xf32, #tpu.memory_space<vmem>>, vector<4x512xf32>
    tpu.vector_store %arg10[%c0_28, %c0_29], %27 {strides = array<i32>} : memref<8x640xf32, #tpu.memory_space<vmem>>, vector<4x512xf32>,
    %c0_30 = arith.constant 0 : index
    %c0_31 = arith.constant 0 : index
    %29 = vector.load %arg10[%c0_30, %c0_31] : memref<8x640xf32, #tpu.memory_space<vmem>>, vector<8x512xf32>
    %c0_32 = arith.constant 0 : index
    %c1_33 = arith.constant 1 : index
    %30 = vector.load %arg10[%c0_32, %c1_33] : memref<8x640xf32, #tpu.memory_space<vmem>>, vector<8x512xf32>
    %c0_34 = arith.constant 0 : index
    %c2_35 = arith.constant 2 : index
    %31 = vector.load %arg10[%c0_34, %c2_35] : memref<8x640xf32, #tpu.memory_space<vmem>>, vector<8x512xf32>
    %c0_36 = arith.constant 0 : index
    %c16_37 = arith.constant 16 : index
    %32 = vector.load %arg10[%c0_36, %c16_37] : memref<8x640xf32, #tpu.memory_space<vmem>>, vector<8x512xf32>
    %c0_38 = arith.constant 0 : index
    %c17_39 = arith.constant 17 : index
    %33 = vector.load %arg10[%c0_38, %c17_39] : memref<8x640xf32, #tpu.memory_space<vmem>>, vector<8x512xf32>
    %c0_40 = arith.constant 0 : index
    %c18_41 = arith.constant 18 : index
    %34 = vector.load %arg10[%c0_40, %c18_41] : memref<8x640xf32, #tpu.memory_space<vmem>>, vector<8x512xf32>
    %c0_42 = arith.constant 0 : index
    %c32_43 = arith.constant 32 : index
    %35 = vector.load %arg10[%c0_42, %c32_43] : memref<8x640xf32, #tpu.memory_space<vmem>>, vector<8x512xf32>
    %c0_44 = arith.constant 0 : index
    %c33_45 = arith.constant 33 : index
    %36 = vector.load %arg10[%c0_44, %c33_45] : memref<8x640xf32, #tpu.memory_space<vmem>>, vector<8x512xf32>
    %c0_46 = arith.constant 0 : index
    %c34_47 = arith.constant 34 : index
    %37 = vector.load %arg10[%c0_46, %c34_47] : memref<8x640xf32, #tpu.memory_space<vmem>>, vector<8x512xf32>
    %38 = tpu.concatenate %29, %30, %31, %32, %33, %34, %35, %36, %37 in 0 : vector<8x512xf32>, vector<8x512xf32>, vector<8x512xf32>, vector<8x512xf32>, vector<8x512xf32>, vector<8x512xf32>, vector<8x512xf32>, vector<8x512xf32>, vector<8x512xf32> -> vector<72x512xf32>
    %c0_48 = arith.constant 0 : index
    %c0_49 = arith.constant 0 : index
    %39 = vector.load %arg7[%c0_48, %c0_49] : memref<4x72xf32, #tpu.memory_space<vmem>>, vector<4x72xf32>
    %cst_50 = arith.constant dense<0.000000e+00> : vector<4x512xf32>
    %40 = tpu.matmul %39, %38, %cst_50 {dimension_numbers = #tpu.dot_dimension_numbers<[1], [0], [0], [1], [0, 0, 1, 1], [], []>} : vector<4x72xf32>, vector<72x512xf32>, vector<4x512xf32> -> vector<4x512xf32>
    %c0_51 = arith.constant 0 : index
    %c0_52 = arith.constant 0 : index
    %41 = vector.load %arg8[%c0_51, %c0_52] : memref<4x1xf32, #tpu.memory_space<vmem>>, vector<4x1xf32>
    %42 = vector.broadcast %41 : vector<4x1xf32> to vector<4x512xf32>
    %43 = arith.addf %40, %42 : vector<4x512xf32>
    %cst_53 = arith.constant 0.000000e+00 : f32
    %44 = vector.broadcast %cst_53 : f32 to vector<4x512xf32>
    %45 = arith.maximumf %43, %44 : vector<4x512xf32>
    %c0_54 = arith.constant 0 : index
    %c0_55 = arith.constant 0 : index
    %46 = vector.load %arg9[%c0_54, %c0_55] : memref<4x512xf32, #tpu.memory_space<vmem>>, vector<4x512xf32>
    tpu.vector_store %arg9[%c0_54, %c0_55], %45 {strides = array<i32>} : memref<4x512xf32, #tpu.memory_space<vmem>>, vector<4x512xf32>,
    return
  }
  func.func @transform_0(%arg0: i32) -> (i32, i32) {
    %c0_i32 = arith.constant 0 : i32
    %c0_i32_0 = arith.constant 0 : i32
    %c0_i32_1 = arith.constant 0 : i32
    return %c0_i32, %c0_i32_0 : i32, i32
  }
  func.func @transform_1(%arg0: i32) -> (i32, i32) {
    %c0_i32 = arith.constant 0 : i32
    %c0_i32_0 = arith.constant 0 : i32
    %c0_i32_1 = arith.constant 0 : i32
    return %c0_i32, %c0_i32_0 : i32, i32
  }
  func.func @transform_2(%arg0: i32) -> (i32, i32) {
    %c0_i32 = arith.constant 0 : i32
    %c0_i32_0 = arith.constant 0 : i32
    %c0_i32_1 = arith.constant 0 : i32
    return %c0_i32, %c0_i32_0 : i32, i32
  }
  func.func @transform_3(%arg0: i32) -> (i32, i32) {
    %c0_i32 = arith.constant 0 : i32
    %c0_i32_0 = arith.constant 0 : i32
    %c0_i32_1 = arith.constant 0 : i32
    return %c0_i32, %c0_i32_0 : i32, i32
  }
  func.func @transform_4(%arg0: i32) -> (i32, i32) {
    %c0_i32 = arith.constant 0 : i32
    %c0_i32_0 = arith.constant 0 : i32
    %c0_i32_1 = arith.constant 0 : i32
    return %c0_i32, %c0_i32_0 : i32, i32
  }
  func.func @transform_5(%arg0: i32) -> (i32, i32) {
    %c0_i32 = arith.constant 0 : i32
    %c0_i32_0 = arith.constant 0 : i32
    %c0_i32_1 = arith.constant 0 : i32
    return %c0_i32, %c0_i32_0 : i32, i32
  }
  func.func @transform_6(%arg0: i32) -> (i32, i32) {
    %c0_i32 = arith.constant 0 : i32
    %c0_i32_0 = arith.constant 0 : i32
    %c0_i32_1 = arith.constant 0 : i32
    return %c0_i32, %c0_i32_0 : i32, i32
  }
  func.func @transform_7(%arg0: i32) -> (i32, i32) {
    %c0_i32 = arith.constant 0 : i32
    %c0_i32_0 = arith.constant 0 : i32
    %c0_i32_1 = arith.constant 0 : i32
    return %c0_i32, %c0_i32_0 : i32, i32
  }
  func.func @transform_8(%arg0: i32) -> (i32, i32) {
    %c0_i32 = arith.constant 0 : i32
    %c0_i32_0 = arith.constant 0 : i32
    %c0_i32_1 = arith.constant 0 : i32
    return %c0_i32, %c0_i32_0 : i32, i32
  }
}

</mosaic_0001>

<bundles_post_ra>
// kernel: conv_up.1
= control target key start
LH: loop header
LB: loop body
LE: loop exit
PB: predicated region body
PF: predicated region fallthrough
CT: control target
= control target key end

     0   :  { %v880_v3 = vmov 0   ;;  %vm52_vm0 = vcmask 261120   ;;  %s883_s21 = smov 96   ;;  %s884_s22 = smov 110   ;;  %vm318_vm1 = vcmask 769024   ;;  %vm299_vm2 = vcmask 777216   ;;  %s1232_s0 = inlined_call_operand.vmem [shape: f32[32,512], index: 0, kind: input, shape index: {}]   ;;  %s1233_s2 = inlined_call_operand.vmem [shape: f32[4,32], index: 2, kind: input, shape index: {}]   ;;  %s1234_s3 = inlined_call_operand.vmem [shape: f32[4,1], index: 3, kind: input, shape index: {}]   ;;  %s1235_s1 = inlined_call_operand.vmem [shape: f32[4,512], index: 1, kind: input, shape index: {}]   ;;  %s1236_s5 = inlined_call_operand.vmem [shape: f32[4,1], index: 5, kind: input, shape index: {}]   ;;  %s1237_s4 = inlined_call_operand.vmem [shape: f32[4,72], index: 4, kind: input, shape index: {}]   ;;  %s1238_s7 = inlined_call_operand.vmem [shape: f32[4,1], index: 7, kind: input, shape index: {}]   ;;  %s1239_s6 = inlined_call_operand.vmem [shape: f32[4,72], index: 6, kind: input, shape index: {}]   ;;  %s1240_s8 = inlined_call_operand.vmem [shape: f32[4,512], index: 8, kind: output, shape index: {}]  }
   0x1   :  { %v42_v0 = vld [vmem:[%s1232_s0 + $0x60] sm:$0xff]  ;;  %v43_v1 = vld [vmem:[%s1232_s0 + $0x68] sm:$0xff]  ;;  %v44_v2 = vld [vmem:[%s1232_s0 + $0x70] sm:$0xff]  ;;  %717 = vset.pattern.permute.xlu0 %v880_v3  ;;  %798 = vset.pattern.permute.xlu1 %v880_v3  ;;  %s885_s23 = smov 111   ;;  %s886_s24 = smov 126   ;;  %vm280_vm3 = vcmask 785408  }
   0x2   :  { %68 = vmatpush.msra.mxu0 %v42_v0  ;;  %88 = vmatpush.msra.mxu1 %v43_v1  ;;  %v45_v4 = vld [vmem:[%s1232_s0 + $0x78] sm:$0xff]  ;;  %v38_v5 = vld [vmem:[%s1232_s0 + $0x40] sm:$0xff]  ;;  %v39_v6 = vld [vmem:[%s1232_s0 + $0x48] sm:$0xff]  ;;  %s887_s25 = smov 112   ;;  %s888_s26 = smov 127   ;;  %vm261_vm4 = vcmask 900096  }
   0x3   :  { %108 = vmatpush.msra.mxu2 %v44_v2  ;;  %128 = vmatpush.msra.mxu3 %v45_v4  ;;  %v40_v7 = vld [vmem:[%s1232_s0 + $0x50] sm:$0xff]  ;;  %v41_v8 = vld [vmem:[%s1232_s0 + $0x58] sm:$0xff]  ;;  %v34_v9 = vld [vmem:[%s1232_s0 + $0x20] sm:$0xff]  ;;  %vm242_vm5 = vcmask 908288   ;;  %vm223_vm6 = vcmask 916480   ;;  %vm204_vm7 = vcmask 1031168  }
   0x4   :  { %69 = vmatpush.msra.mxu0 %v38_v5  ;;  %89 = vmatpush.msra.mxu1 %v39_v6  ;;  %v35_v10 = vld [vmem:[%s1232_s0 + $0x28] sm:$0xff]  ;;  %v36_v11 = vld [vmem:[%s1232_s0 + $0x30] sm:$0xff]  ;;  %v37_v12 = vld [vmem:[%s1232_s0 + $0x38] sm:$0xff]  ;;  %vm185_vm8 = vcmask 1039360   ;;  %vm334_vm9 = vcmask 588800   ;;  %vm684_vm10 = vcmask 1043456  }
   0x5   :  { %109 = vmatpush.msra.mxu2 %v40_v7  ;;  %129 = vmatpush.msra.mxu3 %v41_v8  ;;  %v30_v13 = vld [vmem:[%s1232_s0] sm:$0xff]  ;;  %v31_v14 = vld [vmem:[%s1232_s0 + $0x8] sm:$0xff]  ;;  %v32_v15 = vld [vmem:[%s1232_s0 + $0x10] sm:$0xff] }
   0x6   :  { %70 = vmatpush.msra.mxu0 %v34_v9  ;;  %90 = vmatpush.msra.mxu1 %v35_v10  ;;  %v33_v16 = vld [vmem:[%s1232_s0 + $0x18] sm:$0xff]  ;;  %v29_v17 = vld [vmem:[%s1233_s2] sm:$0xf]  ;;  %v142_v20 = vld [vmem:[%s1235_s1 + $0x8] sm:$0xff] }
   0x7   :  { %110 = vmatpush.msra.mxu2 %v36_v11  ;;  %130 = vmatpush.msra.mxu3 %v37_v12  ;;  %v46_v18 = vld [vmem:[%s1234_s3] sm:$0xf]  ;;  %148 = vst [vmem:[#allocation1 + $0x11] ss:$2 sm:$0xff] %v142_v20  ;;  %s882_s3 = smov 94  }
   0x8   :  { %71 = vmatpush.msra.mxu0 %v30_v13  ;;  %91 = vmatpush.msra.mxu1 %v31_v14  ;;  %v141_v19 = vld [vmem:[%s1235_s1] sm:$0xff]  ;;  %s881_s1 = smov 95  }
   0x9   :  { %111 = vmatpush.msra.mxu2 %v32_v15  ;;  %131 = vmatpush.msra.mxu3 %v33_v16  ;;  %146 = vst [vmem:[#allocation1 + $0x1] ss:$2 sm:$0xff] %v141_v19  ;;  %v328_v20 = vld [vmem:[%s1236_s5] sm:$0xf] }
   0xa   :  { %695 = vmatmul.msk.f32.vlgmr.msra.gmra.mxu0 %vm52_vm0, %v29_v17  ;;  %696 = vmatmul.msk.f32.vlgmr.msra.gmra.mxu1 %vm52_vm0, %v29_v17 }
   0xb   :  { %697 = vmatmul.msk.f32.vlgmr.msra.gmra.mxu2 %vm52_vm0, %v29_v17  ;;  %698 = vmatmul.msk.f32.vlgmr.msra.gmra.mxu3 %vm52_vm0, %v29_v17 }
   0xc   :  { %49 = vperm.xlu0 %717, %v46_v18   ;;  %879 = vset.pattern.permute.xlu2 %v880_v3 }
   0xe   :  { %v152_v23 = vld.sshfl [vmem:[#allocation1 + $0x18] sm:$0xff pattern:$0x75316420]  ;;  %v151_v24 = vld.sshfl [vmem:[#allocation1 + $0x10] sm:$0xff pattern:$0x75316420] }
   0xf   :  { %160 = vst [vmem:[#allocation2 + $0x10] sm:$0xf0] %v152_v23 }
  0x10   :  { %v149_v21 = vld.sshfl [vmem:[#allocation1] sm:$0xff pattern:$0x75316420]  ;;  %v150_v22 = vld.sshfl [vmem:[#allocation1 + $0x8] sm:$0xff pattern:$0x75316420] }
  0x11   :  { %157 = vst [vmem:[#allocation2 + $0x20] sm:$0xf0] %v149_v21 }
  0x12   :  { %158 = vst [vmem:[#allocation2 + $0x18] sm:$0xf0] %v150_v22 }
  0x13   :  { %159 = vst [vmem:[#allocation2 + $0x8] sm:$0xf0] %v151_v24 }
  0x7e   :  { %v50_v25 = vpop.permute.xlu0 %49 }
  0x87   :  { %v73_v26 = vpop.f32.mrf.mxu0  ;;  %v93_v27 = vpop.f32.mrf.mxu1 }
  0x88   :  { %v74_v28 = vadd.f32 %v73_v26, %v50_v25  ;;  %v94_v29 = vadd.f32 %v93_v27, %v50_v25 }
  0x8a   :  { %137 = vst [vmem:[#allocation2 + $0x20] sm:$0xf] %v74_v28 }
  0x8b   :  { %138 = vst [vmem:[#allocation2 + $0x18] sm:$0xf] %v94_v29 }
  0x8e   :  { %v113_v30 = vpop.f32.mrf.mxu2  ;;  %v133_v31 = vpop.f32.mrf.mxu3 }
  0x8f   :  { %v114_v32 = vadd.f32 %v113_v30, %v50_v25  ;;  %v134_v33 = vadd.f32 %v133_v31, %v50_v25 }
  0x91   :  { %139 = vst [vmem:[#allocation2 + $0x8] sm:$0xf] %v114_v32  ;;  %v994_v34 = vld [vmem:[#allocation2 + $0x20] sm:$0xff] }
  0x92   :  { %140 = vst [vmem:[#allocation2 + $0x10] sm:$0xf] %v134_v33  ;;  %289 = vrot.lane.b32.xlu0 %v994_v34, %s881_s1  ;;  %308 = vrot.lane.b32.xlu1 %v994_v34, %s882_s3  ;;  %v1008_v38 = vld [vmem:[#allocation2 + $0x18] sm:$0xff] }
  0x93   :  { %v793_v40 = vpack.i.bf16 %v994_v34, %v1008_v38 }
  0x98   :  { %v1006_v37 = vld [vmem:[#allocation2 + $0x8] sm:$0xff] }
  0x99   :  { %v1000_v35 = vld [vmem:[#allocation2 + $0x10] sm:$0xff]  ;;  %v738_v39 = vpack.i.bf16 %v1008_v38, %v1006_v37 }
  0x9a   :  { %v733_v36 = vpack.i.bf16 0.0, %v1000_v35 }
  0x9c   :  { %734 = vrot.lane.b32.xlu2 %v733_v36, %s883_s21  ;;  %719 = vrot.lane.b32.xlu0 %v733_v36, %s882_s3 }
  0x9d   :  { %724 = vrot.lane.b32.xlu1 %v733_v36, %s881_s1 }
  0xa4   :  { %739 = vrot.lane.b32.xlu2 %v738_v39, %s881_s1  ;;  %744 = vrot.lane.b32.xlu0 %v733_v36, %s884_s22 }
  0xa5   :  { %729 = vrot.lane.b32.xlu1 %v738_v39, %s882_s3 }
  0xac   :  { %754 = vrot.lane.b32.xlu2 %v733_v36, %s885_s23  ;;  %759 = vrot.lane.b32.xlu0 %v738_v39, %s884_s22 }
  0xad   :  { %749 = vrot.lane.b32.xlu1 %v738_v39, %s883_s21 }
  0xb4   :  { %769 = vrot.lane.b32.xlu2 %v738_v39, %s885_s23  ;;  %774 = vrot.lane.b32.xlu0 %v733_v36, %s886_s24 }
  0xb5   :  { %764 = vrot.lane.b32.xlu1 %v733_v36, %s887_s25 }
  0xbc   :  { %784 = vrot.lane.b32.xlu2 %v733_v36, %s888_s26  ;;  %789 = vrot.lane.b32.xlu0 %v738_v39, %s886_s24 }
  0xbd   :  { %779 = vrot.lane.b32.xlu1 %v738_v39, %s887_s25 }
  0xc4   :  { %179 = vrot.lane.b32.xlu2 %v1006_v37, %s888_s26  ;;  %232 = vrot.lane.b32.xlu0 %v994_v34, %s885_s23 }
  0xc5   :  { %270 = vrot.lane.b32.xlu1 %v994_v34, %s883_s21 }
  0xcc   :  { %251 = vrot.lane.b32.xlu2 %v994_v34, %s884_s22  ;;  %194 = vrot.lane.b32.xlu0 %v994_v34, %s886_s24 }
  0xcd   :  { %213 = vrot.lane.b32.xlu1 %v994_v34, %s887_s25 }
  0xd4   :  { %794 = vrot.lane.b32.xlu2 %v793_v40, %s888_s26 }
  0xd5   :  { %331 = vperm.xlu1 %798, %v328_v20  }
  0xf6   :  { %v1039_v41 = vpop.permute.xlu2 %734 }
  0xf7   :  { %v737_v53 = vunpack.i.h.bf16 %v1039_v41  ;;  %v736_v54 = vunpack.i.l.bf16 %v1039_v41 }
  0xf9   :  { %v284_v57 = vsel %vm280_vm3, %v736_v54, %v737_v53 }
  0xfe   :  { %v740_v42 = vpop.permute.xlu2 %739 }
  0xff   :  { %v742_v1 = vunpack.i.h.bf16 %v740_v42  ;;  %v741_v2 = vunpack.i.l.bf16 %v740_v42 }
 0x101   :  { %v301_v11 = vsel %vm299_vm2, %v742_v1, %v741_v2 }
 0x104   :  { %v290_v43 = vpop.permute.xlu0 %289  ;;  %v309_v44 = vpop.permute.xlu1 %308 }
 0x105   :  { %v300_v10 = vsel %vm299_vm2, %v290_v43, %v742_v1 }
 0x106   :  { %v1041_v45 = vpop.permute.xlu2 %754 }
 0x107   :  { %v757_v60 = vunpack.i.h.bf16 %v1041_v45  ;;  %v756_v61 = vunpack.i.l.bf16 %v1041_v45 }
 0x109   :  { %v246_v9 = vsel %vm242_vm5, %v756_v61, %v757_v60 }
 0x10e   :  { %v1043_v46 = vpop.permute.xlu2 %769  ;;  %v720_v47 = vpop.permute.xlu0 %719 }
 0x10f   :  { %v722_v48 = vunpack.i.h.bf16 %v720_v47  ;;  %v721_v49 = vunpack.i.l.bf16 %v720_v47  ;;  %v725_v50 = vpop.permute.xlu1 %724  ;;  %v772_v21 = vunpack.i.h.bf16 %v1043_v46  ;;  %v771_v22 = vunpack.i.l.bf16 %v1043_v46 }
 0x110   :  { %v727_v51 = vunpack.i.h.bf16 %v725_v50  ;;  %v726_v52 = vunpack.i.l.bf16 %v725_v50 }
 0x111   :  { %v322_v55 = vsel %vm318_vm1, %v721_v49, %v722_v48  ;;  %v244_v29 = vsel %vm242_vm5, %v772_v21, %v771_v22  ;;  %v245_v30 = vsel %vm242_vm5, %v771_v22, %v756_v61 }
 0x112   :  { %405 = vmatpush.msrb.mxu3 %v322_v55  ;;  %v303_v56 = vsel %vm299_vm2, %v726_v52, %v727_v51  ;;  %v302_v12 = vsel %vm299_vm2, %v741_v2, %v726_v52 }
 0x114   :  { %406 = vmatpush.msrb.mxu3 %v303_v56 }
 0x116   :  { %v1050_v58 = vpop.permute.xlu2 %784  ;;  %v745_v59 = vpop.permute.xlu0 %744  ;;  %407 = vmatpush.msrb.mxu3 %v284_v57 }
 0x117   :  { %v747_v62 = vunpack.i.h.bf16 %v745_v59  ;;  %v746_v63 = vunpack.i.l.bf16 %v745_v59  ;;  %v730_v0 = vpop.permute.xlu1 %729  ;;  %v787_v40 = vunpack.i.h.bf16 %v1050_v58  ;;  %v786_v41 = vunpack.i.l.bf16 %v1050_v58 }
 0x118   :  { %v732_v3 = vunpack.i.h.bf16 %v730_v0  ;;  %v731_v4 = vunpack.i.l.bf16 %v730_v0 }
 0x119   :  { %v265_v5 = vsel %vm261_vm4, %v746_v63, %v747_v62  ;;  %v189_v45 = vsel %vm185_vm8, %v786_v41, %v787_v40 }
 0x11a   :  { %v319_v6 = vsel %vm318_vm1, %v309_v44, %v732_v3  ;;  %v320_v7 = vsel %vm318_vm1, %v732_v3, %v731_v4  ;;  %v321_v8 = vsel %vm318_vm1, %v731_v4, %v721_v49  ;;  %408 = vmatpush.msrb.mxu3 %v265_v5  ;;  %v327_v49 = vld [vmem:[%s1237_s4] sm:$0xf] }
 0x11b   :  { %345 = vmatpush.msrb.mxu0 %v319_v6  ;;  %365 = vmatpush.msrb.mxu1 %v320_v7 }
 0x11c   :  { %385 = vmatpush.msrb.mxu2 %v321_v8  ;;  %409 = vmatpush.msrb.mxu3 %v246_v9 }
 0x11d   :  { %346 = vmatpush.msrb.mxu0 %v300_v10  ;;  %366 = vmatpush.msrb.mxu1 %v301_v11 }
 0x11e   :  { %386 = vmatpush.msrb.mxu2 %v302_v12  ;;  %v1062_v13 = vpop.permute.xlu2 %179  ;;  %v1064_v14 = vpop.permute.xlu0 %759 }
 0x11f   :  { %v1066_v15 = vpop.permute.xlu1 %749  ;;  %v762_v16 = vunpack.i.h.bf16 %v1064_v14  ;;  %v761_v17 = vunpack.i.l.bf16 %v1064_v14 }
 0x120   :  { %v752_v18 = vunpack.i.h.bf16 %v1066_v15  ;;  %v751_v19 = vunpack.i.l.bf16 %v1066_v15 }
 0x121   :  { %v263_v25 = vsel %vm261_vm4, %v762_v16, %v761_v17  ;;  %v264_v26 = vsel %vm261_vm4, %v761_v17, %v746_v63 }
 0x122   :  { %v282_v23 = vsel %vm280_vm3, %v752_v18, %v751_v19  ;;  %v283_v24 = vsel %vm280_vm3, %v751_v19, %v736_v54 }
 0x123   :  { %367 = vmatpush.msrb.mxu1 %v282_v23  ;;  %387 = vmatpush.msrb.mxu2 %v283_v24 }
 0x125   :  { %368 = vmatpush.msrb.mxu1 %v263_v25  ;;  %388 = vmatpush.msrb.mxu2 %v264_v26 }
 0x126   :  { %v252_v27 = vpop.permute.xlu2 %251  ;;  %v775_v28 = vpop.permute.xlu0 %774 }
 0x127   :  { %v765_v31 = vpop.permute.xlu1 %764  ;;  %369 = vmatpush.msrb.mxu1 %v244_v29  ;;  %389 = vmatpush.msrb.mxu2 %v245_v30  ;;  %v777_v32 = vunpack.i.h.bf16 %v775_v28  ;;  %v776_v33 = vunpack.i.l.bf16 %v775_v28  ;;  %v262_v63 = vsel %vm261_vm4, %v252_v27, %v762_v16 }
 0x128   :  { %v767_v36 = vunpack.i.h.bf16 %v765_v31  ;;  %v766_v39 = vunpack.i.l.bf16 %v765_v31 }
 0x129   :  { %v208_v43 = vsel %vm204_vm7, %v776_v33, %v777_v32 }
 0x12a   :  { %v227_v42 = vsel %vm223_vm6, %v766_v39, %v767_v36 }
 0x12b   :  { %410 = vmatpush.msrb.mxu3 %v227_v42 }
 0x12d   :  { %411 = vmatpush.msrb.mxu3 %v208_v43 }
 0x12e   :  { %v790_v44 = vpop.permute.xlu0 %789  ;;  %v795_v47 = vpop.permute.xlu2 %794 }
 0x12f   :  { %v780_v48 = vpop.permute.xlu1 %779  ;;  %412 = vmatpush.msrb.mxu3 %v189_v45  ;;  %v792_v50 = vunpack.i.h.bf16 %v790_v44  ;;  %v791_v51 = vunpack.i.l.bf16 %v790_v44  ;;  %v796_v54 = vunpack.i.l.bf16 %v795_v47  ;;  %v797_v3 = vunpack.i.h.bf16 %v795_v47 }
 0x130   :  { %v782_v52 = vunpack.i.h.bf16 %v780_v48  ;;  %v781_v53 = vunpack.i.l.bf16 %v780_v48 }
 0x131   :  { %413 = vmatpush.msrb.mxu3 %v1000_v35  ;;  %v206_v57 = vsel %vm204_vm7, %v792_v50, %v791_v51  ;;  %v207_v58 = vsel %vm204_vm7, %v791_v51, %v776_v33  ;;  %v187_v60 = vsel %vm185_vm8, %v796_v54, %v1062_v13  ;;  %v188_v35 = vsel %vm185_vm8, %v1062_v13, %v786_v41 }
 0x132   :  { %702 = vmatmul.msk.f32.vlgmr.msrb.gmra.mxu3 %vm334_vm9, %v327_v49  ;;  %v225_v55 = vsel %vm223_vm6, %v782_v52, %v781_v53  ;;  %v226_v56 = vsel %vm223_vm6, %v781_v53, %v766_v39  ;;  %v186_v4 = vsel %vm185_vm8, %v797_v3, %v796_v54 }
 0x133   :  { %370 = vmatpush.msrb.mxu1 %v225_v55  ;;  %390 = vmatpush.msrb.mxu2 %v226_v56 }
 0x135   :  { %371 = vmatpush.msrb.mxu1 %v206_v57  ;;  %391 = vmatpush.msrb.mxu2 %v207_v58 }
 0x136   :  { %v233_v59 = vpop.permute.xlu0 %232 }
 0x137   :  { %v271_v61 = vpop.permute.xlu1 %270  ;;  %372 = vmatpush.msrb.mxu1 %v187_v60  ;;  %392 = vmatpush.msrb.mxu2 %v188_v35  ;;  %v243_v0 = vsel %vm242_vm5, %v233_v59, %v772_v21 }
 0x138   :  { %v281_v62 = vsel %vm280_vm3, %v271_v61, %v752_v18 }
 0x139   :  { %347 = vmatpush.msrb.mxu0 %v281_v62  ;;  %373 = vmatpush.msrb.mxu1 %v1008_v38 }
 0x13a   :  { %393 = vmatpush.msrb.mxu2 %v1006_v37  ;;  %700 = vmatmul.msk.f32.vlgmr.msrb.gmra.mxu1 %vm334_vm9, %v327_v49 }
 0x13b   :  { %701 = vmatmul.msk.f32.vlgmr.msrb.gmra.mxu2 %vm334_vm9, %v327_v49  ;;  %348 = vmatpush.msrb.mxu0 %v262_v63 }
 0x13d   :  { %349 = vmatpush.msrb.mxu0 %v243_v0 }
 0x13e   :  { %v195_v1 = vpop.permute.xlu0 %194 }
 0x13f   :  { %v214_v2 = vpop.permute.xlu1 %213  ;;  %v205_v37 = vsel %vm204_vm7, %v195_v1, %v792_v50 }
 0x140   :  { %v224_v38 = vsel %vm223_vm6, %v214_v2, %v782_v52 }
 0x141   :  { %350 = vmatpush.msrb.mxu0 %v224_v38 }
 0x143   :  { %351 = vmatpush.msrb.mxu0 %v205_v37 }
 0x145   :  { %352 = vmatpush.msrb.mxu0 %v186_v4 }
 0x147   :  { %353 = vmatpush.msrb.mxu0 %v994_v34  ;;  %v332_v46 = vpop.permute.xlu1 %331 }
 0x148   :  { %699 = vmatmul.msk.f32.vlgmr.msrb.gmra.mxu0 %vm334_vm9, %v327_v49 }
 0x1b5   :  { %v415_v5 = vpop.f32.mrf.mxu3 }
 0x1b6   :  { %v416_v6 = vadd.f32 %v415_v5, %v332_v46 }
 0x1b7   :  { %v375_v7 = vpop.f32.mrf.mxu1 }
 0x1b8   :  { %v421_v8 = vmax.f32 %v416_v6, 0.0  ;;  %v376_v9 = vadd.f32 %v375_v7, %v332_v46 }
 0x1ba   :  { %425 = vst [vmem:[#allocation2 + $0x10] sm:$0xf] %v421_v8  ;;  %v419_v10 = vmax.f32 %v376_v9, 0.0 }
 0x1bc   :  { %423 = vst [vmem:[#allocation2 + $0x18] sm:$0xf] %v419_v10 }
 0x1be   :  { %v395_v11 = vpop.f32.mrf.mxu2 }
 0x1bf   :  { %v396_v12 = vadd.f32 %v395_v11, %v332_v46 }
 0x1c1   :  { %v420_v13 = vmax.f32 %v396_v12, 0.0  ;;  %v1125_v14 = vld [vmem:[#allocation2 + $0x10] sm:$0xff] }
 0x1c2   :  { %v804_v15 = vpack.i.bf16 0.0, %v1125_v14 }
 0x1c3   :  { %424 = vst [vmem:[#allocation2 + $0x8] sm:$0xf] %v420_v13  ;;  %v1129_v18 = vld [vmem:[#allocation2 + $0x18] sm:$0xff] }
 0x1c4   :  { %805 = vrot.lane.b32.xlu0 %v804_v15, %s881_s1 }
 0x1c5   :  { %v355_v34 = vpop.f32.mrf.mxu0 }
 0x1c6   :  { %v356_v16 = vadd.f32 %v355_v34, %v332_v46  ;;  %v585_v34 = vld [vmem:[%s1238_s7] sm:$0xf] }
 0x1c8   :  { %v418_v17 = vmax.f32 %v356_v16, 0.0 }
 0x1ca   :  { %422 = vst [vmem:[#allocation2 + $0x20] sm:$0xf] %v418_v17  ;;  %v1131_v19 = vld [vmem:[#allocation2 + $0x8] sm:$0xff] }
 0x1cb   :  { %v819_v20 = vpack.i.bf16 %v1129_v18, %v1131_v19 }
 0x1cd   :  { %820 = vrot.lane.b32.xlu0 %v819_v20, %s881_s1  ;;  %810 = vrot.lane.b32.xlu1 %v819_v20, %s882_s3 }
 0x1d1   :  { %v1137_v21 = vld [vmem:[#allocation2 + $0x20] sm:$0xff] }
 0x1d2   :  { %566 = vrot.lane.b32.xlu2 %v1137_v21, %s882_s3 }
 0x1d5   :  { %835 = vrot.lane.b32.xlu0 %v804_v15, %s885_s23  ;;  %825 = vrot.lane.b32.xlu1 %v804_v15, %s884_s22 }
 0x1da   :  { %548 = vrot.lane.b32.xlu2 %v1137_v21, %s881_s1 }
 0x1dd   :  { %845 = vrot.lane.b32.xlu0 %v804_v15, %s887_s25  ;;  %494 = vrot.lane.b32.xlu1 %v1137_v21, %s885_s23 }
 0x1e2   :  { %530 = vrot.lane.b32.xlu2 %v1137_v21, %s883_s21 }
 0x1e5   :  { %855 = vrot.lane.b32.xlu0 %v804_v15, %s886_s24  ;;  %840 = vrot.lane.b32.xlu1 %v819_v20, %s884_s22 }
 0x1ea   :  { %800 = vrot.lane.b32.xlu2 %v804_v15, %s882_s3 }
 0x1ed   :  { %865 = vrot.lane.b32.xlu0 %v804_v15, %s888_s26  ;;  %850 = vrot.lane.b32.xlu1 %v819_v20, %s885_s23 }
 0x1f2   :  { %815 = vrot.lane.b32.xlu2 %v804_v15, %s883_s21 }
 0x1f5   :  { %875 = vrot.lane.b32.xlu0 %v819_v20, %s888_s26  ;;  %860 = vrot.lane.b32.xlu1 %v819_v20, %s887_s25 }
 0x1fa   :  { %830 = vrot.lane.b32.xlu2 %v819_v20, %s883_s21 }
 0x1fd   :  { %458 = vrot.lane.b32.xlu0 %v1137_v21, %s886_s24  ;;  %870 = vrot.lane.b32.xlu1 %v819_v20, %s886_s24 }
 0x202   :  { %512 = vrot.lane.b32.xlu2 %v1137_v21, %s884_s22 }
 0x205   :  { %440 = vrot.lane.b32.xlu1 %v1137_v21, %s888_s26 }
 0x20a   :  { %476 = vrot.lane.b32.xlu2 %v1137_v21, %s887_s25 }
 0x212   :  { %588 = vperm.xlu2 %879, %v585_v34  }
 0x22c   :  { %v567_v22 = vpop.permute.xlu2 %566 }
 0x234   :  { %v549_v23 = vpop.permute.xlu2 %548 }
 0x236   :  { %v806_v24 = vpop.permute.xlu0 %805 }
 0x237   :  { %v808_v41 = vunpack.i.h.bf16 %v806_v24  ;;  %v807_v42 = vunpack.i.l.bf16 %v806_v24 }
 0x239   :  { %v561_v51 = vsel %vm299_vm2, %v807_v42, %v808_v41 }
 0x23c   :  { %v531_v25 = vpop.permute.xlu2 %530 }
 0x23f   :  { %v821_v26 = vpop.permute.xlu0 %820  ;;  %v811_v27 = vpop.permute.xlu1 %810 }
 0x240   :  { %v823_v28 = vunpack.i.h.bf16 %v821_v26  ;;  %v822_v29 = vunpack.i.l.bf16 %v821_v26  ;;  %v813_v30 = vunpack.i.h.bf16 %v811_v27  ;;  %v812_v31 = vunpack.i.l.bf16 %v811_v27 }
 0x242   :  { %v576_v32 = vsel %vm318_vm1, %v567_v22, %v813_v30  ;;  %v577_v33 = vsel %vm318_vm1, %v813_v30, %v812_v31  ;;  %v558_v36 = vsel %vm299_vm2, %v549_v23, %v823_v28  ;;  %v559_v39 = vsel %vm299_vm2, %v823_v28, %v822_v29  ;;  %v584_v30 = vld [vmem:[%s1239_s6] sm:$0xf] }
 0x243   :  { %601 = vmatpush.msra.mxu0 %v576_v32  ;;  %621 = vmatpush.msra.mxu1 %v577_v33  ;;  %v560_v50 = vsel %vm299_vm2, %v822_v29, %v807_v42 }
 0x244   :  { %v801_v40 = vpop.permute.xlu2 %800 }
 0x245   :  { %602 = vmatpush.msra.mxu0 %v558_v36  ;;  %622 = vmatpush.msra.mxu1 %v559_v39  ;;  %v803_v43 = vunpack.i.h.bf16 %v801_v40  ;;  %v802_v44 = vunpack.i.l.bf16 %v801_v40 }
 0x247   :  { %v1172_v45 = vpop.permute.xlu0 %835  ;;  %v826_v47 = vpop.permute.xlu1 %825  ;;  %v578_v48 = vsel %vm318_vm1, %v812_v31, %v802_v44  ;;  %v579_v49 = vsel %vm318_vm1, %v802_v44, %v803_v43 }
 0x248   :  { %641 = vmatpush.msra.mxu2 %v578_v48  ;;  %661 = vmatpush.msra.mxu3 %v579_v49  ;;  %v828_v53 = vunpack.i.h.bf16 %v826_v47  ;;  %v827_v54 = vunpack.i.l.bf16 %v826_v47  ;;  %v838_v57 = vunpack.i.h.bf16 %v1172_v45  ;;  %v837_v58 = vunpack.i.l.bf16 %v1172_v45 }
 0x24a   :  { %642 = vmatpush.msra.mxu2 %v560_v50  ;;  %662 = vmatpush.msra.mxu3 %v561_v51  ;;  %v525_v63 = vsel %vm261_vm4, %v827_v54, %v828_v53  ;;  %v507_v0 = vsel %vm242_vm5, %v837_v58, %v838_v57 }
 0x24c   :  { %v816_v52 = vpop.permute.xlu2 %815 }
 0x24d   :  { %v818_v55 = vunpack.i.h.bf16 %v816_v52  ;;  %v817_v56 = vunpack.i.l.bf16 %v816_v52 }
 0x24f   :  { %v1180_v59 = vpop.permute.xlu0 %845  ;;  %v495_v60 = vpop.permute.xlu1 %494  ;;  %v543_v35 = vsel %vm280_vm3, %v817_v56, %v818_v55 }
 0x250   :  { %663 = vmatpush.msra.mxu3 %v543_v35  ;;  %v848_v61 = vunpack.i.h.bf16 %v1180_v59  ;;  %v847_v62 = vunpack.i.l.bf16 %v1180_v59 }
 0x252   :  { %664 = vmatpush.msra.mxu3 %v525_v63  ;;  %v489_v38 = vsel %vm223_vm6, %v847_v62, %v848_v61 }
 0x254   :  { %v831_v1 = vpop.permute.xlu2 %830  ;;  %665 = vmatpush.msra.mxu3 %v507_v0 }
 0x255   :  { %v833_v2 = vunpack.i.h.bf16 %v831_v1  ;;  %v832_v3 = vunpack.i.l.bf16 %v831_v1 }
 0x256   :  { %666 = vmatpush.msra.mxu3 %v489_v38 }
 0x257   :  { %v1188_v37 = vpop.permute.xlu0 %855  ;;  %v841_v4 = vpop.permute.xlu1 %840  ;;  %v540_v46 = vsel %vm280_vm3, %v531_v25, %v833_v2  ;;  %v541_v5 = vsel %vm280_vm3, %v833_v2, %v832_v3  ;;  %v542_v6 = vsel %vm280_vm3, %v832_v3, %v817_v56 }
 0x258   :  { %v858_v7 = vunpack.i.h.bf16 %v1188_v37  ;;  %v857_v8 = vunpack.i.l.bf16 %v1188_v37  ;;  %v843_v9 = vunpack.i.h.bf16 %v841_v4  ;;  %v842_v10 = vunpack.i.l.bf16 %v841_v4  ;;  %603 = vmatpush.msra.mxu0 %v540_v46  ;;  %623 = vmatpush.msra.mxu1 %v541_v5 }
 0x259   :  { %643 = vmatpush.msra.mxu2 %v542_v6 }
 0x25a   :  { %v523_v11 = vsel %vm261_vm4, %v843_v9, %v842_v10  ;;  %v524_v12 = vsel %vm261_vm4, %v842_v10, %v827_v54  ;;  %v471_v13 = vsel %vm204_vm7, %v857_v8, %v858_v7 }
 0x25b   :  { %624 = vmatpush.msra.mxu1 %v523_v11  ;;  %644 = vmatpush.msra.mxu2 %v524_v12 }
 0x25c   :  { %667 = vmatpush.msra.mxu3 %v471_v13  ;;  %v513_v15 = vpop.permute.xlu2 %512 }
 0x25d   :  { %v522_v16 = vsel %vm261_vm4, %v513_v15, %v843_v9 }
 0x25e   :  { %604 = vmatpush.msra.mxu0 %v522_v16 }
 0x25f   :  { %v866_v17 = vpop.permute.xlu0 %865  ;;  %v851_v20 = vpop.permute.xlu1 %850 }
 0x260   :  { %v868_v22 = vunpack.i.h.bf16 %v866_v17  ;;  %v867_v23 = vunpack.i.l.bf16 %v866_v17  ;;  %v853_v24 = vunpack.i.h.bf16 %v851_v20  ;;  %v852_v25 = vunpack.i.l.bf16 %v851_v20 }
 0x262   :  { %v504_v26 = vsel %vm242_vm5, %v495_v60, %v853_v24  ;;  %v505_v27 = vsel %vm242_vm5, %v853_v24, %v852_v25  ;;  %v506_v28 = vsel %vm242_vm5, %v852_v25, %v837_v58  ;;  %v453_v29 = vsel %vm185_vm8, %v867_v23, %v868_v22 }
 0x263   :  { %605 = vmatpush.msra.mxu0 %v504_v26  ;;  %625 = vmatpush.msra.mxu1 %v505_v27 }
 0x264   :  { %645 = vmatpush.msra.mxu2 %v506_v28  ;;  %668 = vmatpush.msra.mxu3 %v453_v29  ;;  %v477_v39 = vpop.permute.xlu2 %476 }
 0x266   :  { %669 = vmatpush.msra.mxu3 %v1125_v14 }
 0x267   :  { %v876_v31 = vpop.permute.xlu0 %875  ;;  %v861_v32 = vpop.permute.xlu1 %860  ;;  %706 = vmatmul.msk.f32.vlgmr.msra.gmra.mxu3 %vm334_vm9, %v584_v30 }
 0x268   :  { %v863_v33 = vunpack.i.h.bf16 %v861_v32  ;;  %v862_v36 = vunpack.i.l.bf16 %v861_v32  ;;  %v878_v44 = vunpack.i.h.bf16 %v876_v31  ;;  %v877_v45 = vunpack.i.l.bf16 %v876_v31 }
 0x26a   :  { %v486_v40 = vsel %vm223_vm6, %v477_v39, %v863_v33  ;;  %v487_v41 = vsel %vm223_vm6, %v863_v33, %v862_v36  ;;  %v488_v42 = vsel %vm223_vm6, %v862_v36, %v847_v62  ;;  %v451_v52 = vsel %vm185_vm8, %v878_v44, %v877_v45 }
 0x26b   :  { %606 = vmatpush.msra.mxu0 %v486_v40  ;;  %626 = vmatpush.msra.mxu1 %v487_v41  ;;  %v452_v53 = vsel %vm185_vm8, %v877_v45, %v867_v23 }
 0x26c   :  { %646 = vmatpush.msra.mxu2 %v488_v42  ;;  %v589_v57 = vpop.permute.xlu2 %588 }
 0x26f   :  { %v871_v43 = vpop.permute.xlu1 %870  ;;  %v459_v48 = vpop.permute.xlu0 %458 }
 0x270   :  { %v873_v14 = vunpack.i.h.bf16 %v871_v43  ;;  %v872_v47 = vunpack.i.l.bf16 %v871_v43 }
 0x272   :  { %v468_v49 = vsel %vm204_vm7, %v459_v48, %v873_v14  ;;  %v469_v50 = vsel %vm204_vm7, %v873_v14, %v872_v47  ;;  %v470_v51 = vsel %vm204_vm7, %v872_v47, %v857_v8 }
 0x273   :  { %607 = vmatpush.msra.mxu0 %v468_v49  ;;  %627 = vmatpush.msra.mxu1 %v469_v50 }
 0x274   :  { %647 = vmatpush.msra.mxu2 %v470_v51 }
 0x275   :  { %628 = vmatpush.msra.mxu1 %v451_v52 }
 0x276   :  { %648 = vmatpush.msra.mxu2 %v452_v53 }
 0x277   :  { %v441_v54 = vpop.permute.xlu1 %440  ;;  %629 = vmatpush.msra.mxu1 %v1129_v18 }
 0x278   :  { %649 = vmatpush.msra.mxu2 %v1131_v19  ;;  %v450_v55 = vsel %vm185_vm8, %v441_v54, %v878_v44  ;;  %704 = vmatmul.msk.f32.vlgmr.msra.gmra.mxu1 %vm334_vm9, %v584_v30 }
 0x279   :  { %705 = vmatmul.msk.f32.vlgmr.msra.gmra.mxu2 %vm334_vm9, %v584_v30  ;;  %608 = vmatpush.msra.mxu0 %v450_v55 }
 0x27b   :  { %609 = vmatpush.msra.mxu0 %v1137_v21 }
 0x27c   :  { %703 = vmatmul.msk.f32.vlgmr.msra.gmra.mxu0 %vm334_vm9, %v584_v30 }
 0x2ea   :  { %v671_v56 = vpop.f32.mrf.mxu3 }
 0x2eb   :  { %v672_v59 = vadd.f32 %v671_v56, %v589_v57 }
 0x2ed   :  { %v677_v61 = vmax.f32 %v672_v59, 0.0 }
 0x2ef   :  { %v683_v1 = vrot.slane %v677_v61, 4 }
 0x2f5   :  { %v631_v58 = vpop.f32.mrf.mxu1 }
 0x2f6   :  { %v632_v60 = vadd.f32 %v631_v58, %v589_v57 }
 0x2f8   :  { %v675_v35 = vmax.f32 %v632_v60, 0.0 }
 0x2f9   :  { %v611_v18 = vpop.f32.mrf.mxu0 }
 0x2fa   :  { %v682_v19 = vrot.slane %v675_v35, 4  ;;  %v612_v62 = vadd.f32 %v611_v18, %v589_v57 }
 0x2fc   :  { %v674_v63 = vmax.f32 %v612_v62, 0.0  ;;  %v651_v0 = vpop.f32.mrf.mxu2 }
 0x2fd   :  { %v652_v2 = vadd.f32 %v651_v0, %v589_v57 }
 0x2fe   :  { %v685_v3 = vsel %vm684_vm10, %v674_v63, %v682_v19 }
 0x2ff   :  { %689 = vst [vmem:[%s1240_s8] sm:$0xff] %v685_v3  ;;  %v676_v21 = vmax.f32 %v652_v2, 0.0 }
 0x301   :  { %v686_v38 = vsel %vm684_vm10, %v676_v21, %v683_v1 }
 0x302   :  { %690 = vst [vmem:[%s1240_s8 + $0x8] sm:$0xff] %v686_v38 }

</bundles_post_ra>
